<compile_context>
chip_gen: v6e
topology: v6e:2x2x1
jax: 0.10.0
libtpu: 0.0.40
codegen_flags: <defaults>
</compile_context>

<pallas_src>
import jax
import jax.numpy as jnp
from jax.experimental import pallas as pl
from jax.experimental.pallas import tpu as pltpu

_MAX_LANES = 8192                # cap on the lane-dense last dim (multiple of 128)
_MIN_PALLAS_ELEMS = 256 * 1024   # below this, pallas_call fixed cost dominates


def _sublane_multiple(dtype) -> int:
    """Native sublane tile: 8 for 32-bit, 16 for 16-bit, 32 for 8-bit dtypes."""
    bits = jnp.dtype(dtype).itemsize * 8
    return max(8, 256 // bits)


def _block_params():
    """(target_block_bytes, vmem_limit_bytes), gated on the chip generation."""
    try:
        info = pltpu.get_tpu_info()
        vmem = getattr(info, "vmem_capacity_bytes", None)
    except Exception:  # not on TPU / API mismatch -> conservative settings
        vmem = None
    if vmem is not None and vmem >= 96 * 1024 * 1024:
        # v5e / v6e: 128 MiB VMEM -> 8 MiB blocks (32 MiB double-buffered I/O)
        return 8 * 1024 * 1024, 64 * 1024 * 1024
    # v7x (64 MiB VMEM) or unknown: 4 MiB blocks (16 MiB double-buffered I/O)
    return 4 * 1024 * 1024, 32 * 1024 * 1024


def _pick_lanes(n: int):
    """Largest multiple of 128 that divides n, capped at _MAX_LANES.

    Returns None when n is not a multiple of 128 (caller falls back to jnp).
    """
    if n % 128 != 0:
        return None
    m = n // 128
    for d in range(min(m, _MAX_LANES // 128), 0, -1):
        if m % d == 0:
            return 128 * d
    return 128


def _swish_kernel(x_ref, o_ref):
    x = x_ref[...]
    xf = x.astype(jnp.float32)
    # swish(x) = x * sigmoid(x) = 0.5 * x * (1 + tanh(x / 2))
    # single-tanh form => one EUP op per element (vs exp + reciprocal)
    y = 0.5 * xf * (1.0 + jnp.tanh(0.5 * xf))
    o_ref[...] = y.astype(o_ref.dtype)


def _swish_2d(x2d):
    """x2d: (R, C) lane-dense array (C % 128 == 0). Streamed elementwise swish."""
    R, C = x2d.shape
    sub = _sublane_multiple(x2d.dtype)
    itemsize = jnp.dtype(x2d.dtype).itemsize
    target_block_bytes, vmem_limit = _block_params()

    # Row tile: target large blocks, rounded down to the dtype's sublane
    # multiple, never larger than the (sublane-rounded-up) row count.
    tr = max(sub, target_block_bytes // (C * itemsize))
    tr -= tr % sub
    r_up = ((R + sub - 1) // sub) * sub
    tr = min(tr, r_up)

    # Guarantee >= 2 grid steps when possible so the parallel axis shards
    # across both TensorCores on v7x.
    steps = (R + tr - 1) // tr
    if steps < 2 and R > sub:
        half = (R + 1) // 2
        tr = max(sub, ((half + sub - 1) // sub) * sub)
        steps = (R + tr - 1) // tr

    n = R * C
    cost = pl.CostEstimate(
        flops=4 * n,
        transcendentals=n,
        bytes_accessed=2 * n * itemsize,
    )

    return pl.pallas_call(
        _swish_kernel,
        out_shape=jax.ShapeDtypeStruct((R, C), x2d.dtype),
        grid_spec=pltpu.PrefetchScalarGridSpec(
            num_scalar_prefetch=0,
            grid=(steps,),
            in_specs=[pl.BlockSpec((tr, C), lambda i: (i, 0))],
            out_specs=pl.BlockSpec((tr, C), lambda i: (i, 0)),
        ),
        compiler_params=pltpu.CompilerParams(
            # parallel grid axis -> sharded across the 2 TensorCores on v7x
            dimension_semantics=("parallel",),
            vmem_limit_bytes=vmem_limit,
        ),
        cost_estimate=cost,
    )(x2d)


def swish(x, *, min_pallas_elems=_MIN_PALLAS_ELEMS):
    """Swish forward matching `x * torch.sigmoid(x)` for arbitrary-shaped x."""
    n = x.size
    if n == 0:
        return x

    lanes = _pick_lanes(n)
    if lanes is None or n < min_pallas_elems:
        # Tiny or lane-misaligned tensor: a single fused XLA elementwise pass
        # is already at the HBM roofline and avoids any pad/concat/slice copies.
        return (x * jax.nn.sigmoid(x)).astype(x.dtype)

    # Free (bitcast-style) reshape into a lane-dense 2-D slab; no padding needed
    # because `lanes` divides n exactly.
    x2d = jnp.reshape(x, (n // lanes, lanes))
    y2d = _swish_2d(x2d)
    return jnp.reshape(y2d, x.shape)


if __name__ == "__main__":
    key = jax.random.PRNGKey(0)
    k0, k1 = jax.random.split(key)

    # Small NCHW input, as the PyTorch module would typically see.
    x_small = jax.random.normal(k0, (2, 4, 16, 16), dtype=jnp.float32)
    ref_small = x_small * jax.nn.sigmoid(x_small)

    # 1) Default path on a tiny tensor -> fused-jnp fallback.
    y_small = jax.block_until_ready(swish(x_small))
    assert y_small.shape == x_small.shape and y_small.dtype == x_small.dtype
    assert jnp.max(jnp.abs(y_small - ref_small)) < 1e-5

    # 2) Force the Pallas kernel on the same small tensor (compile + correctness).
    y_pallas = jax.block_until_ready(swish(x_small, min_pallas_elems=0))
    assert y_pallas.shape == x_small.shape and y_pallas.dtype == x_small.dtype
    assert jnp.max(jnp.abs(y_pallas - ref_small)) < 1e-5

    # 3) Medium tensor that takes the Pallas path by default (multi-step grid).
    x_med = jax.random.normal(k1, (4, 32, 64, 64), dtype=jnp.float32)
    y_med = jax.block_until_ready(swish(x_med))
    ref_med = x_med * jax.nn.sigmoid(x_med)
    assert y_med.shape == x_med.shape and y_med.dtype == x_med.dtype
    assert jnp.max(jnp.abs(y_med - ref_med)) < 1e-5

    print("KERNEL_OK")
</pallas_src>

<mosaic_0001>
module attributes {stable_mosaic.version = 11 : i64} {
  func.func @_swish_kernel(%arg0: i32, %arg1: memref<8x2048xf32, #tpu.memory_space<vmem>>, %arg2: memref<8x2048xf32, #tpu.memory_space<vmem>>) attributes {dimension_semantics = [#tpu.dimension_semantics<parallel>], iteration_bounds = array<i64: 1>, scalar_prefetch = 0 : i64, scratch_operands = 0 : i64, tpu.core_type = #tpu.core_type<tc>, window_params = [{transform_indices = @transform_0, window_bounds = array<i64: 8, 2048>}, {transform_indices = @transform_1, window_bounds = array<i64: 8, 2048>}]} {
    %c0 = arith.constant 0 : index
    %c0_0 = arith.constant 0 : index
    %0 = vector.load %arg1[%c0, %c0_0] : memref<8x2048xf32, #tpu.memory_space<vmem>>, vector<8x2048xf32>
    %cst = arith.constant 5.000000e-01 : f32
    %1 = vector.broadcast %cst : f32 to vector<8x2048xf32>
    %2 = arith.mulf %1, %0 : vector<8x2048xf32>
    %cst_1 = arith.constant 5.000000e-01 : f32
    %3 = vector.broadcast %cst_1 : f32 to vector<8x2048xf32>
    %4 = arith.mulf %3, %0 : vector<8x2048xf32>
    %5 = math.tanh %4 : vector<8x2048xf32>
    %cst_2 = arith.constant 1.000000e+00 : f32
    %6 = vector.broadcast %cst_2 : f32 to vector<8x2048xf32>
    %7 = arith.addf %6, %5 : vector<8x2048xf32>
    %8 = arith.mulf %2, %7 : vector<8x2048xf32>
    %c0_3 = arith.constant 0 : index
    %c0_4 = arith.constant 0 : index
    %9 = vector.load %arg2[%c0_3, %c0_4] : memref<8x2048xf32, #tpu.memory_space<vmem>>, vector<8x2048xf32>
    tpu.vector_store %arg2[%c0_3, %c0_4], %8 {strides = array<i32>} : memref<8x2048xf32, #tpu.memory_space<vmem>>, vector<8x2048xf32>,
    return
  }
  func.func @transform_0(%arg0: i32) -> (i32, i32) {
    %c0_i32 = arith.constant 0 : i32
    %c0_i32_0 = arith.constant 0 : i32
    return %arg0, %c0_i32 : i32, i32
  }
  func.func @transform_1(%arg0: i32) -> (i32, i32) {
    %c0_i32 = arith.constant 0 : i32
    %c0_i32_0 = arith.constant 0 : i32
    return %arg0, %c0_i32 : i32, i32
  }
}

</mosaic_0001>

<bundles_post_ra>
// kernel: tpu_custom_call.1
= control target key start
LH: loop header
LB: loop body
LE: loop exit
PB: predicated region body
PF: predicated region fallthrough
CT: control target
= control target key end

     0   :  { %6 = vsyncpa [#allocation3], 0  ;;  %s266_s0 = inlined_call_operand.hbm [shape: f32[1,2048], index: 0, kind: input, shape index: {}]   ;;  %s267_s1 = inlined_call_operand.hbm [shape: f32[1,2048], index: 1, kind: output, shape index: {}]  }
   0x1   :  { %7 = vsyncpa [#allocation4], 0 }
   0x2   :  { %12 = vsyncadd [#allocation3], 1792  ;;  %s216_s6 = smov [#allocation2]  }
   0x3   :  { %s13_s7 = sshll.u32 %s216_s6, 4  ;;  %s14_s7 = int_to_ptr.vmem [resolvable:$true] %s13_s7 }
   0x4   :  { %s180_s8 = scalar_lea.vmem %s14_s7, 256  ;;  %s184_s9 = scalar_lea.vmem %s14_s7, 2048 }
   0x5   :  { %p181_p0 = scmp.ne.s32.totalorder %s14_s7, %s180_s8  ;;  %p185_p1 = scmp.lt.s32.totalorder %s14_s7, %s14_s7 }
   0x6   :  { %p186_p2 = scmp.lt.s32.totalorder %s184_s9, %s180_s8 }
   0x8   :  { %p187_p3 = por %p186_p2, %p185_p1 }
   0xa   :  { %p188_p4 = pnand %p187_p3, %p181_p0 }
   0xc   :  { %191 = shalt.err (!%p188_p4)
}
   0xd   :  { %s217_s10 = smov 256   ;;  %s218_s11 = smov 16  }
   0xe   :  { %19 = dma.hbm_to_vmem [thread:$0]  %s266_s0, 256, %s14_s7, [#allocation3], %s217_s10, %s217_s10, %s218_s11  }
   0xf   :  { %212 = dma.done.wait [#allocation3], 2048  }
  0x10   :  { %213 = vsyncadd [#allocation3], 4294965248  ;;  %v23_v0 = vld [vmem:[#allocation2] sm:$0xff]  ;;  %v24_v1 = vld [vmem:[#allocation2 + $0x8] sm:$0xff] }
  0x11   :  { %v25_v2 = vld [vmem:[#allocation2 + $0x10] sm:$0xff]  ;;  %v39_v3 = vmul.f32 0.5, %v23_v0  ;;  %v40_v4 = vmul.f32 0.5, %v24_v1  ;;  %v26_v6 = vld [vmem:[#allocation2 + $0x18] sm:$0xff]  ;;  %v27_v7 = vld [vmem:[#allocation2 + $0x20] sm:$0xff] }
  0x12   :  { %v41_v5 = vmul.f32 0.5, %v25_v2  ;;  %v28_v8 = vld [vmem:[#allocation2 + $0x28] sm:$0xff]  ;;  %v42_v9 = vmul.f32 0.5, %v26_v6  ;;  %v29_v10 = vld [vmem:[#allocation2 + $0x30] sm:$0xff]  ;;  %v43_v11 = vmul.f32 0.5, %v27_v7  ;;  %v30_v12 = vld [vmem:[#allocation2 + $0x38] sm:$0xff] }
  0x13   :  { %140 = vtanh.f32 %v39_v3  ;;  %v44_v13 = vmul.f32 0.5, %v28_v8  ;;  %v31_v14 = vld [vmem:[#allocation2 + $0x40] sm:$0xff]  ;;  %v45_v15 = vmul.f32 0.5, %v29_v10  ;;  %v32_v16 = vld [vmem:[#allocation2 + $0x48] sm:$0xff]  ;;  %v46_v17 = vmul.f32 0.5, %v30_v12  ;;  %v33_v18 = vld [vmem:[#allocation2 + $0x50] sm:$0xff] }
  0x14   :  { %142 = vtanh.f32 %v40_v4  ;;  %v47_v19 = vmul.f32 0.5, %v31_v14  ;;  %v34_v20 = vld [vmem:[#allocation2 + $0x58] sm:$0xff]  ;;  %v48_v21 = vmul.f32 0.5, %v32_v16  ;;  %v35_v22 = vld [vmem:[#allocation2 + $0x60] sm:$0xff]  ;;  %v236_v23 = vmul.f32 0.5, %v33_v18  ;;  %v36_v24 = vld [vmem:[#allocation2 + $0x68] sm:$0xff] }
  0x15   :  { %144 = vtanh.f32 %v41_v5  ;;  %v238_v25 = vmul.f32 0.5, %v34_v20  ;;  %v37_v26 = vld [vmem:[#allocation2 + $0x70] sm:$0xff]  ;;  %v240_v27 = vmul.f32 0.5, %v35_v22  ;;  %v38_v28 = vld [vmem:[#allocation2 + $0x78] sm:$0xff]  ;;  %v242_v29 = vmul.f32 0.5, %v36_v24 }
  0x16   :  { %146 = vtanh.f32 %v42_v9  ;;  %v245_v30 = vmul.f32 0.5, %v37_v26  ;;  %v248_v31 = vmul.f32 0.5, %v38_v28 }
  0x17   :  { %148 = vtanh.f32 %v43_v11 }
  0x18   :  { %150 = vtanh.f32 %v44_v13 }
  0x19   :  { %152 = vtanh.f32 %v45_v15 }
  0x1a   :  { %154 = vtanh.f32 %v46_v17 }
  0x1b   :  { %156 = vtanh.f32 %v47_v19 }
  0x1c   :  { %158 = vtanh.f32 %v48_v21 }
  0x1d   :  { %160 = vtanh.f32 %v236_v23 }
  0x1e   :  { %162 = vtanh.f32 %v238_v25 }
  0x1f   :  { %164 = vtanh.f32 %v240_v27 }
  0x20   :  { %v141_v32 = vpop.eup %140  ;;  %166 = vtanh.f32 %v242_v29 }
  0x21   :  { %v143_v33 = vpop.eup %142  ;;  %v71_v34 = vadd.f32 1.0, %v141_v32  ;;  %168 = vtanh.f32 %v245_v30 }
  0x22   :  { %v145_v35 = vpop.eup %144  ;;  %v72_v36 = vadd.f32 1.0, %v143_v33  ;;  %170 = vtanh.f32 %v248_v31 }
  0x23   :  { %v147_v37 = vpop.eup %146  ;;  %v87_v38 = vmul.f32 %v71_v34, %v39_v3  ;;  %v73_v39 = vadd.f32 1.0, %v145_v35 }
  0x24   :  { %v149_v40 = vpop.eup %148  ;;  %v88_v41 = vmul.f32 %v72_v36, %v40_v4  ;;  %v74_v42 = vadd.f32 1.0, %v147_v37 }
  0x25   :  { %v151_v43 = vpop.eup %150  ;;  %103 = vst [vmem:[#allocation5] sm:$0xff] %v87_v38  ;;  %v89_v44 = vmul.f32 %v73_v39, %v41_v5  ;;  %v75_v45 = vadd.f32 1.0, %v149_v40 }
  0x26   :  { %v153_v46 = vpop.eup %152  ;;  %104 = vst [vmem:[#allocation5 + $0x8] sm:$0xff] %v88_v41  ;;  %v90_v47 = vmul.f32 %v74_v42, %v42_v9  ;;  %v76_v48 = vadd.f32 1.0, %v151_v43 }
  0x27   :  { %v155_v49 = vpop.eup %154  ;;  %105 = vst [vmem:[#allocation5 + $0x10] sm:$0xff] %v89_v44  ;;  %v91_v50 = vmul.f32 %v75_v45, %v43_v11  ;;  %v77_v51 = vadd.f32 1.0, %v153_v46 }
  0x28   :  { %v157_v52 = vpop.eup %156  ;;  %106 = vst [vmem:[#allocation5 + $0x18] sm:$0xff] %v90_v47  ;;  %v92_v53 = vmul.f32 %v76_v48, %v44_v13  ;;  %v78_v54 = vadd.f32 1.0, %v155_v49 }
  0x29   :  { %v159_v55 = vpop.eup %158  ;;  %107 = vst [vmem:[#allocation5 + $0x20] sm:$0xff] %v91_v50  ;;  %v93_v56 = vmul.f32 %v77_v51, %v45_v15  ;;  %v79_v57 = vadd.f32 1.0, %v157_v52 }
  0x2a   :  { %v161_v58 = vpop.eup %160  ;;  %108 = vst [vmem:[#allocation5 + $0x28] sm:$0xff] %v92_v53  ;;  %v94_v59 = vmul.f32 %v78_v54, %v46_v17  ;;  %v80_v60 = vadd.f32 1.0, %v159_v55 }
  0x2b   :  { %v163_v61 = vpop.eup %162  ;;  %109 = vst [vmem:[#allocation5 + $0x30] sm:$0xff] %v93_v56  ;;  %v95_v62 = vmul.f32 %v79_v57, %v47_v19  ;;  %v81_v63 = vadd.f32 1.0, %v161_v58 }
  0x2c   :  { %v165_v0 = vpop.eup %164  ;;  %110 = vst [vmem:[#allocation5 + $0x38] sm:$0xff] %v94_v59  ;;  %v96_v1 = vmul.f32 %v80_v60, %v48_v21  ;;  %v82_v2 = vadd.f32 1.0, %v163_v61 }
  0x2d   :  { %v167_v3 = vpop.eup %166  ;;  %111 = vst [vmem:[#allocation5 + $0x40] sm:$0xff] %v95_v62  ;;  %v97_v4 = vmul.f32 %v81_v63, %v236_v23  ;;  %v83_v5 = vadd.f32 1.0, %v165_v0 }
  0x2e   :  { %v169_v6 = vpop.eup %168  ;;  %112 = vst [vmem:[#allocation5 + $0x48] sm:$0xff] %v96_v1  ;;  %v98_v7 = vmul.f32 %v82_v2, %v238_v25  ;;  %v84_v8 = vadd.f32 1.0, %v167_v3 }
  0x2f   :  { %v171_v9 = vpop.eup %170  ;;  %113 = vst [vmem:[#allocation5 + $0x50] sm:$0xff] %v97_v4  ;;  %v99_v10 = vmul.f32 %v83_v5, %v240_v27  ;;  %v85_v11 = vadd.f32 1.0, %v169_v6 }
  0x30   :  { %114 = vst [vmem:[#allocation5 + $0x58] sm:$0xff] %v98_v7  ;;  %v100_v12 = vmul.f32 %v84_v8, %v242_v29  ;;  %v86_v13 = vadd.f32 1.0, %v171_v9 }
  0x31   :  { %115 = vst [vmem:[#allocation5 + $0x60] sm:$0xff] %v99_v10  ;;  %v101_v14 = vmul.f32 %v85_v11, %v245_v30 }
  0x32   :  { %116 = vst [vmem:[#allocation5 + $0x68] sm:$0xff] %v100_v12  ;;  %v102_v15 = vmul.f32 %v86_v13, %v248_v31 }
  0x33   :  { %117 = vst [vmem:[#allocation5 + $0x70] sm:$0xff] %v101_v14 }
  0x34   :  { %118 = vst [vmem:[#allocation5 + $0x78] sm:$0xff] %v102_v15 }
  0x35   :  { %123 = vsyncadd [#allocation4], 1792  ;;  %s219_s0 = smov [#allocation5]  }
  0x36   :  { %s124_s14 = sshll.u32 %s219_s0, 4  ;;  %s125_s14 = int_to_ptr.vmem [resolvable:$true] %s124_s14 }
  0x37   :  { %s192_s15 = scalar_lea.vmem %s125_s14, 256  ;;  %s196_s16 = scalar_lea.vmem %s125_s14, 2048 }
  0x38   :  { %p193_p5 = scmp.ne.s32.totalorder %s125_s14, %s192_s15  ;;  %p197_p6 = scmp.lt.s32.totalorder %s125_s14, %s125_s14 }
  0x39   :  { %p198_p7 = scmp.lt.s32.totalorder %s196_s16, %s192_s15 }
  0x3b   :  { %p199_p8 = por %p198_p7, %p197_p6 }
  0x3d   :  { %p200_p9 = pnand %p199_p8, %p193_p5 }
  0x3f   :  { %203 = shalt.err (!%p200_p9)
}
  0x40   :  { %130 = dma.vmem_to_hbm [thread:$0]  %s125_s14, 256, %s267_s1, [#allocation4], %s217_s10, %s217_s10, %s218_s11  }
  0x41   :  { %214 = dma.done.wait [#allocation4], 2048  }
  0x42   :  { %215 = vsyncadd [#allocation4], 4294965248 }
  0x43   :  { %134 = vsyncpa [#allocation3], 1 }
  0x44   :  { %135 = vsyncpa [#allocation4], 1 }

</bundles_post_ra>
